<compile_context>
chip_gen: v7x
topology: tpu7x:2x2x1
jax: 0.10.0
libtpu: 0.0.40
codegen_flags: <defaults>
</compile_context>

<pallas_src>
import numpy as np
import jax
import jax.numpy as jnp
from jax import lax
from jax.experimental import pallas as pl
from jax.experimental.pallas import tpu as pltpu


# ----------------------------------------------------------------------------
# Host-side parameter preparation (done once per set of weights)
# ----------------------------------------------------------------------------
def build_spatial_conv_matrix(w_sp_flat, H, W, C, dtype=jnp.bfloat16):
    """Fold Conv2d(2,1,7,pad=3,no bias) into one (2*HW, HW) block-Toeplitz matrix.

    Rows [0:HW] act on the channel-MEAN map (the 1/C of the mean is folded in so
    the kernel can feed a plain channel SUM), rows [HW:2*HW] act on the MAX map.
    Built entirely in host numpy: no device-side scatter on the critical path.
    """
    HW = H * W
    w = np.asarray(w_sp_flat, np.float64).reshape(2, 7, 7)
    K = np.zeros((2 * HW, HW), np.float64)
    c, di, dj, h, wc = np.meshgrid(np.arange(2), np.arange(7), np.arange(7),
                                   np.arange(H), np.arange(W), indexing="ij")
    hi = h + di - 3                       # input row hit by tap di at output row h
    wi = wc + dj - 3                      # input col hit by tap dj at output col w
    valid = (hi >= 0) & (hi < H) & (wi >= 0) & (wi < W)
    rows = (c * HW + hi * W + wi)[valid]  # input-pixel index (per channel block)
    cols = (h * W + wc)[valid]            # output-pixel index
    vals = w[c[valid], di[valid], dj[valid]]
    np.add.at(K, (rows, cols), vals)
    K[:HW] *= 1.0 / C                     # fold channel-mean 1/C
    return jnp.asarray(K, dtype)


def prepare_cbam_params(w_fc1, w_fc2, w_sp_flat, C, H, W):
    """w_fc1: (C//16, C), w_fc2: (C, C//16), w_sp_flat: (2*7*7,) — PyTorch layouts."""
    w1 = jnp.asarray(w_fc1, jnp.float32)
    # sigmoid(fc(max_pool(x)) + fc(avg_pool(x))) == sigmoid(2*fc(x)); fold the 2.
    w2 = jnp.asarray(w_fc2, jnp.float32) * 2.0
    k = build_spatial_conv_matrix(w_sp_flat, H, W, C, dtype=jnp.bfloat16)
    return w1, w2, k


def _pick_batch_block(n, target=32):
    """Images per grid step: big enough to amortize per-step overhead, but keep
    >= 2 grid steps when possible (v7x has 2 TensorCores)."""
    b = max(1, min(target, n // 2 if n >= 2 else 1))
    while n % b:
        b -= 1
    return b


# ----------------------------------------------------------------------------
# Pallas kernel + wrapper
# ----------------------------------------------------------------------------
def _sigmoid(z):
    # exp -> EUP; approx reciprocal -> EUP: keeps VPU slots free on the big tensors.
    return pl.reciprocal(1.0 + jnp.exp(-z), approx=True)


def cbam_attention(x_nchw, w1, w2_scaled, k_mat, *, batch_block=None):
    """CBAM forward, NCHW in / NCHW out (output dtype == input dtype)."""
    N, C, H, W = x_nchw.shape
    Cr = w1.shape[0]
    HW = H * W
    B = batch_block if batch_block is not None else _pick_batch_block(N)
    assert N % B == 0

    # Free reshape (collapse contiguous trailing dims) — no transposes, no astype.
    x_flat = x_nchw.reshape(N, C, HW)

    def kernel(x_ref, w1_ref, w2_ref, k_ref, o_ref):
        x = x_ref[...].astype(jnp.float32)                     # (B, C, HW), pixels on lanes

        # ---------------- channel attention ----------------
        # 1x1 convs == matmuls over the channel (sublane) axis, stacked over the
        # B images of this block as one batched dot_general (no per-image loop).
        w1b = jnp.broadcast_to(w1_ref[...], (B, Cr, C))
        h = lax.dot_general(w1b, x, (((2,), (1,)), ((0,), (0,))),
                            preferred_element_type=jnp.float32)       # (B, Cr, HW)
        h = jnp.maximum(h, 0.0)
        w2b = jnp.broadcast_to(w2_ref[...], (B, C, Cr))                # 2x already folded in
        y = lax.dot_general(w2b, h, (((2,), (1,)), ((0,), (0,))),
                            preferred_element_type=jnp.float32)       # (B, C, HW)
        ca = _sigmoid(y)
        x1 = ca * x                                                    # channel-attended

        # ---------------- spatial attention ----------------
        # Channel sum (1/C folded into K) and channel max via XLU sublane reduces;
        # both stay in the pixels-on-lanes (B, HW) layout.
        ssum = jnp.sum(x1, axis=1)                                     # (B, HW)
        smax = jnp.max(x1, axis=1)                                     # (B, HW)

        # 7x7 padded conv == ONE stacked MXU GEMM against the precomputed
        # block-Toeplitz matrix: (B, 2*HW) @ (2*HW, HW), bf16 operands, f32 acc.
        lhs = jnp.concatenate([ssum, smax], axis=-1).astype(jnp.bfloat16)
        acc = jnp.dot(lhs, k_ref[...], preferred_element_type=jnp.float32)  # (B, HW)
        sa = _sigmoid(acc)

        # Sublane broadcast of sa over channels; lane-dense unmasked store.
        o_ref[...] = (x1 * sa[:, None, :]).astype(o_ref.dtype)

    out_flat = pl.pallas_call(
        kernel,
        out_shape=jax.ShapeDtypeStruct((N, C, HW), x_nchw.dtype),
        grid_spec=pltpu.PrefetchScalarGridSpec(
            num_scalar_prefetch=0,
            grid=(N // B,),
            in_specs=[
                pl.BlockSpec((B, C, HW), lambda n: (n, 0, 0)),
                pl.BlockSpec((Cr, C), lambda n: (0, 0)),
                pl.BlockSpec((C, Cr), lambda n: (0, 0)),
                # K's block index never changes; for large HW add
                # pipeline_mode=pl.Buffered(1) to avoid double-buffering it.
                pl.BlockSpec((2 * HW, HW), lambda n: (0, 0)),
            ],
            out_specs=pl.BlockSpec((B, C, HW), lambda n: (n, 0, 0)),
        ),
        compiler_params=pltpu.CompilerParams(
            dimension_semantics=("parallel",)),
    )(x_flat, w1, w2_scaled, k_mat)

    return out_flat.reshape(N, C, H, W)


# ----------------------------------------------------------------------------
# Pure-JAX reference of the PyTorch forward (NCHW, f32)
# ----------------------------------------------------------------------------
def cbam_reference(x, w_fc1, w_fc2, w_sp_flat):
    x = x.astype(jnp.float32)
    h = jnp.maximum(jnp.einsum("rc,nchw->nrhw", w_fc1, x), 0.0)
    y = jnp.einsum("cr,nrhw->nchw", w_fc2, h)
    ca = jax.nn.sigmoid(2.0 * y)
    x1 = ca * x
    avg = jnp.mean(x1, axis=1, keepdims=True)
    mx = jnp.max(x1, axis=1, keepdims=True)
    feat = jnp.concatenate([avg, mx], axis=1)                 # (N, 2, H, W)
    rhs = w_sp_flat.reshape(1, 2, 7, 7)                       # OIHW
    sa = lax.conv_general_dilated(
        feat, rhs, window_strides=(1, 1), padding=[(3, 3), (3, 3)],
        dimension_numbers=("NCHW", "OIHW", "NCHW"))
    sa = jax.nn.sigmoid(sa)                                   # (N, 1, H, W)
    return x1 * sa


if __name__ == "__main__":
    key = jax.random.PRNGKey(0)
    N, C, H, W = 4, 32, 16, 16            # C >= 16 so Conv2d(C, C//16, 1) is valid
    Cr = C // 16
    k1_, k2_, k3_, k4_ = jax.random.split(key, 4)
    x = jax.random.normal(k1_, (N, C, H, W), jnp.float32)
    # Synthetic weights in PyTorch (out, in) layout, shapes implied by __init__.
    w_fc1 = jax.random.normal(k2_, (Cr, C), jnp.float32) * 0.2   # Conv2d(C, C//16, 1).weight
    w_fc2 = jax.random.normal(k3_, (C, Cr), jnp.float32) * 0.2   # Conv2d(C//16, C, 1).weight
    w_sp = jax.random.normal(k4_, (2 * 7 * 7,), jnp.float32) * 0.1  # Conv2d(2,1,7).weight.flatten()

    w1, w2s, kmat = prepare_cbam_params(w_fc1, w_fc2, w_sp, C, H, W)
    out = cbam_attention(x, w1, w2s, kmat)
    jax.block_until_ready(out)

    ref = cbam_reference(x, w_fc1, w_fc2, w_sp)
    assert out.shape == x.shape
    err = float(jnp.max(jnp.abs(out - ref)))
    # Tolerance accounts for bf16 Toeplitz-GEMM operands + approx EUP reciprocal.
    assert err < 5e-2, f"max abs err {err}"
    print("KERNEL_OK")
</pallas_src>

<mosaic_0001>
module attributes {stable_mosaic.version = 11 : i64} {
  func.func @kernel(%arg0: i32, %arg1: memref<2x32x256xf32, #tpu.memory_space<vmem>>, %arg2: memref<2x32xf32, #tpu.memory_space<vmem>>, %arg3: memref<32x2xf32, #tpu.memory_space<vmem>>, %arg4: memref<512x256xbf16, #tpu.memory_space<vmem>>, %arg5: memref<2x32x256xf32, #tpu.memory_space<vmem>>) attributes {dimension_semantics = [#tpu.dimension_semantics<parallel>], iteration_bounds = array<i64: 2>, scalar_prefetch = 0 : i64, scratch_operands = 0 : i64, tpu.core_type = #tpu.core_type<tc>, window_params = [{transform_indices = @transform_0, window_bounds = array<i64: 2, 32, 256>}, {pipeline_mode = #tpu.pipeline_mode<synchronous>, transform_indices = @transform_1, window_bounds = array<i64: 2, 32>}, {pipeline_mode = #tpu.pipeline_mode<synchronous>, transform_indices = @transform_2, window_bounds = array<i64: 32, 2>}, {pipeline_mode = #tpu.pipeline_mode<synchronous>, transform_indices = @transform_3, window_bounds = array<i64: 512, 256>}, {transform_indices = @transform_4, window_bounds = array<i64: 2, 32, 256>}]} {
    %c0 = arith.constant 0 : index
    %c0_0 = arith.constant 0 : index
    %c0_1 = arith.constant 0 : index
    %0 = vector.load %arg1[%c0, %c0_0, %c0_1] : memref<2x32x256xf32, #tpu.memory_space<vmem>>, vector<2x32x256xf32>
    %c0_2 = arith.constant 0 : index
    %c0_3 = arith.constant 0 : index
    %1 = vector.load %arg2[%c0_2, %c0_3] : memref<2x32xf32, #tpu.memory_space<vmem>>, vector<2x32xf32>
    %2 = vector.shape_cast %1 : vector<2x32xf32> to vector<1x2x32xf32>
    %3 = vector.broadcast %2 : vector<1x2x32xf32> to vector<2x2x32xf32>
    %cst = arith.constant dense<0.000000e+00> : vector<2x2x256xf32>
    %4 = tpu.matmul %3, %0, %cst {dimension_numbers = #tpu.dot_dimension_numbers<[2], [1], [1], [2], [0, 0, 0, 1, 1, 2], [0], [0]>} : vector<2x2x32xf32>, vector<2x32x256xf32>, vector<2x2x256xf32> -> vector<2x2x256xf32>
    %cst_4 = arith.constant 0.000000e+00 : f32
    %5 = vector.broadcast %cst_4 : f32 to vector<2x2x256xf32>
    %6 = arith.maximumf %4, %5 : vector<2x2x256xf32>
    %c0_5 = arith.constant 0 : index
    %c0_6 = arith.constant 0 : index
    %7 = vector.load %arg3[%c0_5, %c0_6] : memref<32x2xf32, #tpu.memory_space<vmem>>, vector<32x2xf32>
    %8 = vector.shape_cast %7 : vector<32x2xf32> to vector<1x32x2xf32>
    %9 = vector.broadcast %8 : vector<1x32x2xf32> to vector<2x32x2xf32>
    %cst_7 = arith.constant dense<0.000000e+00> : vector<2x32x256xf32>
    %10 = tpu.matmul %9, %6, %cst_7 {dimension_numbers = #tpu.dot_dimension_numbers<[2], [1], [1], [2], [0, 0, 0, 1, 1, 2], [0], [0]>} : vector<2x32x2xf32>, vector<2x2x256xf32>, vector<2x32x256xf32> -> vector<2x32x256xf32>
    %cst_8 = arith.constant 0.000000e+00 : f32
    %11 = vector.broadcast %cst_8 : f32 to vector<2x32x256xf32>
    %12 = arith.subf %11, %10 : vector<2x32x256xf32>
    %13 = math.exp %12 : vector<2x32x256xf32>
    %cst_9 = arith.constant 1.000000e+00 : f32
    %14 = vector.broadcast %cst_9 : f32 to vector<2x32x256xf32>
    %15 = arith.addf %14, %13 : vector<2x32x256xf32>
    %16 = tpu.reciprocal %15 {approx = true} : vector<2x32x256xf32> -> vector<2x32x256xf32>
    %17 = arith.mulf %16, %0 : vector<2x32x256xf32>
    %cst_10 = arith.constant dense<0.000000e+00> : vector<2x256xf32>
    %18 = vector.multi_reduction <add>, %17, %cst_10 [1] : vector<2x32x256xf32> to vector<2x256xf32>
    %cst_11 = arith.constant dense<0xFF800000> : vector<2x256xf32>
    %19 = vector.multi_reduction <maximumf>, %17, %cst_11 [1] : vector<2x32x256xf32> to vector<2x256xf32>
    %20 = tpu.concatenate %18, %19 in 1 : vector<2x256xf32>, vector<2x256xf32> -> vector<2x512xf32>
    %21 = arith.truncf %20 : vector<2x512xf32> to vector<2x512xbf16>
    %c0_12 = arith.constant 0 : index
    %c0_13 = arith.constant 0 : index
    %22 = vector.load %arg4[%c0_12, %c0_13] : memref<512x256xbf16, #tpu.memory_space<vmem>>, vector<512x256xbf16>
    %cst_14 = arith.constant dense<0.000000e+00> : vector<2x256xf32>
    %23 = tpu.matmul %21, %22, %cst_14 {dimension_numbers = #tpu.dot_dimension_numbers<[1], [0], [0], [1], [0, 0, 1, 1], [], []>} : vector<2x512xbf16>, vector<512x256xbf16>, vector<2x256xf32> -> vector<2x256xf32>
    %cst_15 = arith.constant 0.000000e+00 : f32
    %24 = vector.broadcast %cst_15 : f32 to vector<2x256xf32>
    %25 = arith.subf %24, %23 : vector<2x256xf32>
    %26 = math.exp %25 : vector<2x256xf32>
    %cst_16 = arith.constant 1.000000e+00 : f32
    %27 = vector.broadcast %cst_16 : f32 to vector<2x256xf32>
    %28 = arith.addf %27, %26 : vector<2x256xf32>
    %29 = tpu.reciprocal %28 {approx = true} : vector<2x256xf32> -> vector<2x256xf32>
    %30 = vector.shape_cast %29 : vector<2x256xf32> to vector<2x1x256xf32>
    %31 = vector.broadcast %30 : vector<2x1x256xf32> to vector<2x32x256xf32>
    %32 = arith.mulf %17, %31 : vector<2x32x256xf32>
    %c0_17 = arith.constant 0 : index
    %c0_18 = arith.constant 0 : index
    %c0_19 = arith.constant 0 : index
    %33 = vector.load %arg5[%c0_17, %c0_18, %c0_19] : memref<2x32x256xf32, #tpu.memory_space<vmem>>, vector<2x32x256xf32>
    tpu.vector_store %arg5[%c0_17, %c0_18, %c0_19], %32 {strides = array<i32>} : memref<2x32x256xf32, #tpu.memory_space<vmem>>, vector<2x32x256xf32>,
    return
  }
  func.func @transform_0(%arg0: i32) -> (i32, i32, i32) {
    %c0_i32 = arith.constant 0 : i32
    %c0_i32_0 = arith.constant 0 : i32
    %c0_i32_1 = arith.constant 0 : i32
    return %arg0, %c0_i32, %c0_i32_0 : i32, i32, i32
  }
  func.func @transform_1(%arg0: i32) -> (i32, i32) {
    %c0_i32 = arith.constant 0 : i32
    %c0_i32_0 = arith.constant 0 : i32
    %c0_i32_1 = arith.constant 0 : i32
    return %c0_i32, %c0_i32_0 : i32, i32
  }
  func.func @transform_2(%arg0: i32) -> (i32, i32) {
    %c0_i32 = arith.constant 0 : i32
    %c0_i32_0 = arith.constant 0 : i32
    %c0_i32_1 = arith.constant 0 : i32
    return %c0_i32, %c0_i32_0 : i32, i32
  }
  func.func @transform_3(%arg0: i32) -> (i32, i32) {
    %c0_i32 = arith.constant 0 : i32
    %c0_i32_0 = arith.constant 0 : i32
    %c0_i32_1 = arith.constant 0 : i32
    return %c0_i32, %c0_i32_0 : i32, i32
  }
  func.func @transform_4(%arg0: i32) -> (i32, i32, i32) {
    %c0_i32 = arith.constant 0 : i32
    %c0_i32_0 = arith.constant 0 : i32
    %c0_i32_1 = arith.constant 0 : i32
    return %arg0, %c0_i32, %c0_i32_0 : i32, i32, i32
  }
}

</mosaic_0001>

<bundles_post_ra>
// kernel: tpu_custom_call.1
= control target key start
LH: loop header
LB: loop body
LE: loop exit
PB: predicated region body
PF: predicated region fallthrough
CT: control target
= control target key end

     0   :  { %9 = vsyncpa [#allocation3], 0  ;;  %s2389_s0 = inlined_call_operand.hbm [shape: f32[4,32,256], index: 0, kind: input, shape index: {}]   ;;  %s2390_s1 = inlined_call_operand.vmem [shape: f32[2,32], index: 1, kind: input, shape index: {}]   ;;  %s2391_s2 = inlined_call_operand.vmem [shape: f32[32,2], index: 2, kind: input, shape index: {}]   ;;  %s2392_s3 = inlined_call_operand.hbm [shape: bf16[512,256], index: 3, kind: input, shape index: {}]   ;;  %s2393_s4 = inlined_call_operand.hbm [shape: f32[4,32,256], index: 4, kind: output, shape index: {}]  }
   0x1   :  { %11 = vsyncpa [#allocation3 + $0x1], 0 }
   0x2   :  { %12 = vsyncpa [#allocation6], 0 }
   0x3   :  { %13 = vsyncpa [#allocation4], 0 }
   0x4   :  { %15 = vsyncpa [#allocation4 + $0x1], 0  ;;  %s1966_s15 = smov 0   ;;  %s1968_s16 = smov 0  }
   0x5   :  { %s1970_s17 = smov 0   ;;  %s1972_s18 = smov 0  }
   0x6 LB: > { %s1987_s19 = sadd.s32 4294967295, %s1928_s18   ;;  %s1449_s20 = sadd.s32 4294967294, %s1928_s18   ;;  %s1928_s18 = sphi %s1972_s18, %s2413_s18   ;;  %s1924_s17 = sphi %s1970_s17, %s2412_s17   ;;  %s1920_s16 = sphi %s1968_s16, %s2411_s16   ;;  %s1916_s15 = sphi %s1966_s15, %s2410_s15  }
   0x7   : > { %p41_p0 = scmp.ne.s32.totalorder %s1920_s16, %s1916_s15  ;;  %p2394_p1 = scmp.eq.s32.totalorder %s1987_s19, 0 }
   0x8   : > { %p134_p3 = scmp.eq.s32.totalorder %s1449_s20, 1  ;;  %p1450_p5 = scmp.ge.s32.totalorder %s1928_s18, 1 }
   0x9   : > { %p1996_p4 = por %p2394_p1, %p41_p0  ;;  %p141_p7 = scmp.lt.s32.totalorder %s1928_s18, 3 }
   0xa   : > { %p2001_p6 = por %p134_p3, %p41_p0  ;;  %s1930_s24 = smov [#allocation5]  }
   0xb   : > { %s2397_s21 = scalar_select %p1996_p4, 1, 0 }
   0xc   : > { %s2398_s22 = scalar_select %p2001_p6, 1, 0 }
   0xd   : > { %p2006_p8 = pnand %p1450_p5, %p141_p7  ;;  %s159_s25 = sshll.u32 %s1930_s24, 4  ;;  %s2010_s25 = int_to_ptr.vmem [resolvable:$true] %s159_s25 }
   0xe   : > { %s2022_s27 = sadd.s32 1, %s1928_s18   ;;  %s28_s28 = sadd.s32 1, %s1924_s17 }
   0xf   : > { %s2399_s23 = scalar_select %p2006_p8, 1, 0 }
  0x10   : > { %p1575_p9 = pneg %p2006_p8  ;;  %s25_s29 = ssub.s32 %s1928_s18, %s2022_s27 }
  0x11   : > { %s1800_s6 = scalar_lea.hbm %s2392_s3, 8192 }
  0x12   : > { %p2017_p11 = pnand %p1575_p9, %p2394_p1  ;;  %p1801_p12 = scmp.ne.s32.totalorder %s2392_s3, %s1800_s6 }
  0x13   : > { %p1807_p5 = scmp.lt.u32.totalorder %s1800_s6, %s2392_s3 }
  0x14   : > { %p1802_p13 = pneg %p2017_p11 }
  0x16   : > { %p1803_p0 = pnand %p1802_p13, %p1801_p12 }
  0x18   : > { %p1804_p3 = pneg %p1803_p0 }
  0x1a   : > { %p1809_p7 = pnand %p1807_p5, %p1804_p3 }
  0x1c   : > { %1812 = shalt.err (!%p1809_p7)
}
  0x1d   : > { %s1813_s11 = scalar_lea.vmem %s2010_s25, 8192  ;;  %p1821_p2 = scmp.lt.s32.totalorder %s2010_s25, %s2010_s25 }
  0x1e   : > { %p1814_p9 = scmp.ne.s32.totalorder %s2010_s25, %s1813_s11  ;;  %p1822_p6 = scmp.lt.s32.totalorder %s1813_s11, %s1813_s11 }
  0x20   : > { %p1816_p10 = pnand %p1814_p9, %p1802_p13  ;;  %p1823_p4 = por %p1822_p6, %p1821_p2 }
  0x22   : > { %p1817_p1 = pneg %p1816_p10 }
  0x24   : > { %p1824_p8 = pnand %p1823_p4, %p1817_p1 }
  0x26   : > { %1827 = shalt.err (!%p1824_p8)
}
  0x27   : > { %s1931_s12 = smov 128   ;;  %s1932_s13 = smov 8  }
  0x28   : > { %1578 = dma.hbm_to_vmem [thread:$0]  (!%p2017_p11), %s2392_s3, 8192, %s2010_s25, [#allocation6], %s1931_s12, %s1931_s12, %s1932_s13  }
  0x29   : > { %p26_p2 = scmp.eq.s32.totalorder %s25_s29, 0  ;;  %p35_p1 = scmp.ne.s32.totalorder %s1924_s17, %s1920_s16 }
  0x2a   : > { %p36_p4 = scmp.eq.s32.totalorder %s1928_s18, 0  ;;  %p1588_p6 = scmp.lt.s32.totalorder %s1928_s18, 2 }
  0x2b   : > { %s2053_s24 = scalar_select %p26_p2, %s1924_s17, %s28_s28  }
  0x2c   : > { %p37_p8 = por %p36_p4, %p35_p1  ;;  %p2401_p10 = scmp.eq.s32.totalorder %s1987_s19, 1 }
  0x2d   : > { %s173_s5 = sand.u32 1, %s1924_s17   ;;  %s1546_s6 = sshll.u32 %s1928_s18, 11 }
  0x2e   : > { %p2057_p12 = por %p2401_p10, %p35_p1  ;;  %s1453_s7 = sshll.u32 %s173_s5, 7 }
  0x2f   : > { %s2066_s9 = scalar_lea.hbm %s2389_s0, %s1546_s6  ;;  %s177_s25 = scalar_lea.vmem [#allocation2], %s1453_s7 }
  0x30   : > { %s185_s28 = sshll.u32 %s177_s25, 4  ;;  %p2068_p11 = pnand %p1588_p6, %p37_p8  ;;  %s2072_s28 = int_to_ptr.vmem [resolvable:$true] %s185_s28 }
  0x31   : > { %s2074_s10 = scalar_lea.sflag [#allocation3], %s173_s5  ;;  %s1828_s11 = scalar_lea.hbm %s2066_s9, 2048 }
  0x32   : > { %p1829_p13 = scmp.ne.s32.totalorder %s2066_s9, %s1828_s11  ;;  %p1830_p0 = pneg %p2068_p11 }
  0x33   : > { %s1833_s14 = scalar_lea.hbm %s2389_s0, 4096  ;;  %p1834_p7 = scmp.lt.u32.totalorder %s2066_s9, %s2389_s0 }
  0x34   : > { %p1831_p3 = pnand %p1830_p0, %p1829_p13  ;;  %p1835_p9 = scmp.lt.u32.totalorder %s1833_s14, %s1828_s11 }
  0x35   : > { %p1837_p1 = scmp.lt.u32.totalorder %s1828_s11, %s2066_s9 }
  0x36   : > { %p1832_p5 = pneg %p1831_p3  ;;  %p1836_p2 = por %p1835_p9, %p1834_p7 }
  0x38   : > { %p1838_p4 = por %p1837_p1, %p1836_p2 }
  0x3a   : > { %p1839_p6 = pnand %p1838_p4, %p1832_p5 }
  0x3c   : > { %1842 = shalt.err (!%p1839_p6)
}
  0x3d   : > { %s1843_s5 = scalar_lea.vmem %s2072_s28, 2048  ;;  %s1933_s7 = smov [#allocation2]  }
  0x3e   : > { %p1844_p8 = scmp.ne.s32.totalorder %s2072_s28, %s1843_s5  ;;  %s1848_s26 = sshll.u32 %s1933_s7, 4  ;;  %s1849_s26 = int_to_ptr.vmem [resolvable:$false] %s1848_s26 }
  0x3f   : > { %s1850_s8 = scalar_lea.vmem %s1849_s26, 4096  ;;  %p1851_p3 = scmp.lt.s32.totalorder %s2072_s28, %s1849_s26 }
  0x40   : > { %p1846_p10 = pnand %p1844_p8, %p1830_p0  ;;  %p1852_p7 = scmp.lt.s32.totalorder %s1850_s8, %s1843_s5 }
  0x42   : > { %p1847_p13 = pneg %p1846_p10  ;;  %p1853_p9 = por %p1852_p7, %p1851_p3 }
  0x44   : > { %p1854_p2 = pnand %p1853_p9, %p1847_p13 }
  0x46   : > { %1857 = shalt.err (!%p1854_p2)
}
  0x47   : > { %s1934_s25 = smov 256   ;;  %s1935_s11 = smov 16  }
  0x48   : > { %1582 = dma.hbm_to_vmem [thread:$0]  (!%p2068_p11), %s2066_s9, 2048, %s2072_s28, %s2074_s10, %s1934_s25, %s1934_s25, %s1935_s11  }
  0x49   : > { %p2404_p0 = scmp.ne.s32.totalorder %s2399_s23, 0 }
  0x4a   : > { %s2105_s12 = sand.u32 (!%p2404_p0), 1, %s1920_s16   ;;  %p2405_p5 = scmp.ne.s32.totalorder (!%p2404_p0), %s2397_s21, 0 }
  0x4b   : > { %197 = sbr.rel (%p2404_p0) target bundleno = 879 (0x36f), region = 36  ;;  %s1458_s13 = sshll.u32 (!%p2404_p0), %s2105_s12, 7 }
  0x4c   : > { %s200_s14 = scalar_lea.sflag (!%p2404_p0), [#allocation3], %s2105_s12  ;;  %s2111_s20 = scalar_lea.vmem (!%p2404_p0), [#allocation2], %s1458_s13 }
  0x52   : > { %1903 = dma.done.wait (%p2405_p5), %s200_s14, 2048  }
  0x53   : > { %1905 = vsyncadd (%p2405_p5), %s200_s14, 4294965248  ;;  %p2406_p11 = scmp.eq.s32.totalorder %s1987_s19, 0 }
  0x55   : > { %1907 = dma.done.wait (%p2406_p11), [#allocation6], 8192   ;;  %p2407_p1 = pmov %p2406_p11 }
  0x56   : > { %v1936_v0 = vmov 0.0   ;;  %v2124_v1 = vld [vmem:[%s2111_s20 + $0x8] sm:$0xff]  ;;  %v2127_v2 = vld [vmem:[%s2111_s20 + $0x18] sm:$0xff]  ;;  %v2138_v6 = vld [vmem:[%s2111_s20] sm:$0xff]  ;;  %vm251_vm0 = vcmask 261120   ;;  %vm418_vm1 = vcmask 1041408  }
  0x57   : > { %1909 = vsyncadd (%p2407_p1), [#allocation6], 4294959104  ;;  %319 = vmatprep.mubr.f32.mxu0 %v1936_v0  ;;  %390 = vmatprep.mubr.f32.mxu1 %v1936_v0  ;;  %v2130_v3 = vld [vmem:[%s2111_s20 + $0x48] sm:$0xff]  ;;  %v1549_v4 = vpack.c.bf16 %v2127_v2, %v2124_v1  ;;  %v2135_v5 = vld [vmem:[%s2111_s20 + $0x58] sm:$0xff]  ;;  %vm405_vm2 = vcmask 15360   ;;  %vm781_vm3 = vcmask 1041409  }
  0x58   : > { %v2141_v7 = vld [vmem:[%s2111_s20 + $0x10] sm:$0xff]  ;;  %v1557_v8 = vpack.c.bf16 %v2135_v5, %v2130_v3  ;;  %v2148_v10 = vld [vmem:[%s2111_s20 + $0x40] sm:$0xff]  ;;  %v2154_v12 = vld [vmem:[%s2111_s20 + $0x28] sm:$0xff]  ;;  %s1548_s8 = sshll.u32 %s1987_s19, 11  ;;  %s2307_s25 = scalar_lea.vmem [#allocation7], %s1458_s13 }
  0x59   : > { %v1551_v9 = vpack.c.bf16 %v2141_v7, %v2138_v6  ;;  %v2151_v11 = vld [vmem:[%s2111_s20 + $0x50] sm:$0xff]  ;;  %1550 = vmatprep.subr.bf16.mxu0 %v1549_v4  ;;  %v2159_v14 = vld [vmem:[%s2111_s20 + $0x38] sm:$0xff]  ;;  %v2162_v15 = vld [vmem:[%s2111_s20 + $0x68] sm:$0xff]  ;;  %s1366_s11 = sshll.u32 %s2307_s25, 4  ;;  %s2331_s14 = scalar_lea.hbm %s2393_s4, %s1548_s8  ;;  %s2333_s11 = int_to_ptr.vmem [resolvable:$true] %s1366_s11 }
  0x5a   : > { %v1559_v13 = vpack.c.bf16 %v2151_v11, %v2148_v10  ;;  %v2165_v16 = vld [vmem:[%s2111_s20 + $0x78] sm:$0xff]  ;;  %1558 = vmatprep.subr.bf16.mxu1 %v1557_v8  ;;  %v1553_v17 = vpack.c.bf16 %v2159_v14, %v2154_v12  ;;  %v2172_v19 = vld [vmem:[%s2111_s20 + $0x20] sm:$0xff]  ;;  %v2175_v20 = vld [vmem:[%s2111_s20 + $0x30] sm:$0xff]  ;;  %s1858_s21 = scalar_lea.vmem %s2333_s11, 2048  ;;  %s1938_s23 = smov [#allocation7]  }
  0x5b   : > { %1552 = vmatpush1.bf16.msra.mxu0 %v1551_v9  ;;  %v1561_v18 = vpack.c.bf16 %v2165_v16, %v2162_v15  ;;  %v2178_v21 = vld [vmem:[%s2111_s20 + $0x60] sm:$0xff]  ;;  %v1555_v22 = vpack.c.bf16 %v2175_v20, %v2172_v19  ;;  %v2183_v23 = vld [vmem:[%s2111_s20 + $0x70] sm:$0xff]  ;;  %v402_v38 = vld [vmem:[%s2391_s2 + $0x8] sm:$0xff]  ;;  %s1352_s20 = scalar_lea.sflag [#allocation4], %s2105_s12  ;;  %p1859_p4 = scmp.ne.s32.totalorder %s2333_s11, %s1858_s21 }
  0x5c   : > { %1560 = vmatpush1.bf16.msra.mxu1 %v1559_v13  ;;  %1554 = vmatprep.subr.bf16.mxu0 %v1553_v17  ;;  %v1563_v24 = vpack.c.bf16 %v2183_v23, %v2178_v21  ;;  %v250_v25 = vld [vmem:[%s2390_s1] sm:$0x3]  ;;  %v1634_v35 = vld [vmem:[#allocation5 + $0x4] ss:$8 sps:$4 sm:$0xff]   ;;  %v403_v40 = vld [vmem:[%s2391_s2 + $0x10] sm:$0xff]  ;;  %s1862_s9 = sshll.u32 %s1938_s23, 4  ;;  %s1863_s9 = int_to_ptr.vmem [resolvable:$false] %s1862_s9 }
  0x5d   : > { %1562 = vmatprep.subr.bf16.mxu1 %v1561_v18  ;;  %v401_v33 = vld [vmem:[%s2391_s2] sm:$0xff]  ;;  %v404_v41 = vld [vmem:[%s2391_s2 + $0x18] sm:$0xff]  ;;  %p1860_p6 = pnand %p1859_p4, %p2057_p12  ;;  %s1864_s28 = scalar_lea.vmem %s1863_s9, 4096 }
  0x5e   : > { %v1632_v36 = vld [vmem:[#allocation5] ss:$8 sps:$4 sm:$0xff]   ;;  %v1637_v37 = vld [vmem:[#allocation5 + $0x104] ss:$8 sps:$4 sm:$0xff]   ;;  %v1640_v42 = vld [vmem:[#allocation5 + $0x14] ss:$8 sps:$4 sm:$0xff]   ;;  %p1865_p10 = scmp.lt.s32.totalorder %s2333_s11, %s1863_s9  ;;  %p1866_p13 = scmp.lt.s32.totalorder %s1864_s28, %s1858_s21 }
  0x5f   : > { %1556 = vmatpush1.bf16.msra.mxu0 %v1555_v22  ;;  %v1635_v39 = vld [vmem:[#allocation5 + $0x100] ss:$8 sps:$4 sm:$0xff]   ;;  %v1643_v43 = vld [vmem:[#allocation5 + $0x114] ss:$8 sps:$4 sm:$0xff]   ;;  %v1638_v44 = vld [vmem:[#allocation5 + $0x10] ss:$8 sps:$4 sm:$0xff]   ;;  %p1861_p8 = pneg %p1860_p6 }
  0x60   : > { %1564 = vmatpush1.bf16.msra.mxu1 %v1563_v24  ;;  %v1641_v45 = vld [vmem:[#allocation5 + $0x110] ss:$8 sps:$4 sm:$0xff]   ;;  %v1646_v46 = vld [vmem:[#allocation5 + $0x24] ss:$8 sps:$4 sm:$0xff]   ;;  %v1644_v48 = vld [vmem:[#allocation5 + $0x20] ss:$8 sps:$4 sm:$0xff]   ;;  %p1867_p3 = por %p1866_p13, %p1865_p10 }
  0x61   : > { %v1649_v47 = vld [vmem:[#allocation5 + $0x124] ss:$8 sps:$4 sm:$0xff]   ;;  %v1647_v49 = vld [vmem:[#allocation5 + $0x120] ss:$8 sps:$4 sm:$0xff]   ;;  %v1652_v50 = vld [vmem:[#allocation5 + $0x34] ss:$8 sps:$4 sm:$0xff]  }
  0x62   : > { %1461 = vmatmul.mubr.msk.f32.vlgmr.msra.gmra.mrb[0].mxu0 %vm251_vm0, %v250_v25  ;;  %v1655_v51 = vld [vmem:[#allocation5 + $0x134] ss:$8 sps:$4 sm:$0xff]   ;;  %v1650_v52 = vld [vmem:[#allocation5 + $0x30] ss:$8 sps:$4 sm:$0xff]   ;;  %v1658_v54 = vld [vmem:[#allocation5 + $0x44] ss:$8 sps:$4 sm:$0xff]   ;;  %p1868_p7 = pnand %p1867_p3, %p1861_p8 }
  0x63   : > { %1462 = vmatmul.mubr.msk.f32.vlgmr.msra.gmra.mrb[0].mxu1 %vm251_vm0, %v250_v25  ;;  %489 = vmatprep.mubr.f32.mxu0 %v1936_v0  ;;  %v1653_v53 = vld [vmem:[#allocation5 + $0x130] ss:$8 sps:$4 sm:$0xff]   ;;  %v1661_v55 = vld [vmem:[#allocation5 + $0x144] ss:$8 sps:$4 sm:$0xff]   ;;  %v1656_v56 = vld [vmem:[#allocation5 + $0x40] ss:$8 sps:$4 sm:$0xff]  }
  0x64   : > { %584 = vmatprep.mubr.f32.mxu1 %v1936_v0  ;;  %v1659_v57 = vld [vmem:[#allocation5 + $0x140] ss:$8 sps:$4 sm:$0xff]   ;;  %v1664_v58 = vld [vmem:[#allocation5 + $0x54] ss:$8 sps:$4 sm:$0xff]   ;;  %v1662_v60 = vld [vmem:[#allocation5 + $0x50] ss:$8 sps:$4 sm:$0xff]  }
  0x65   : > { %v1667_v59 = vld [vmem:[#allocation5 + $0x154] ss:$8 sps:$4 sm:$0xff]   ;;  %v1665_v61 = vld [vmem:[#allocation5 + $0x150] ss:$8 sps:$4 sm:$0xff]   ;;  %v1670_v62 = vld [vmem:[#allocation5 + $0x64] ss:$8 sps:$4 sm:$0xff]  }
  0x66   : > { %v1673_v63 = vld [vmem:[#allocation5 + $0x164] ss:$8 sps:$4 sm:$0xff]   ;;  %v1671_v4 = vld [vmem:[#allocation5 + $0x160] ss:$8 sps:$4 sm:$0xff]   ;;  %v1676_v8 = vld [vmem:[#allocation5 + $0x74] ss:$8 sps:$4 sm:$0xff]  }
  0x67   : > { %v1679_v9 = vld [vmem:[#allocation5 + $0x174] ss:$8 sps:$4 sm:$0xff]   ;;  %v1674_v13 = vld [vmem:[#allocation5 + $0x70] ss:$8 sps:$4 sm:$0xff]   ;;  %v1682_v18 = vld [vmem:[#allocation5 + $0x84] ss:$8 sps:$4 sm:$0xff]  }
  0x68   : > { %v1677_v17 = vld [vmem:[#allocation5 + $0x170] ss:$8 sps:$4 sm:$0xff]   ;;  %v1685_v22 = vld [vmem:[#allocation5 + $0x184] ss:$8 sps:$4 sm:$0xff]   ;;  %v1680_v24 = vld [vmem:[#allocation5 + $0x80] ss:$8 sps:$4 sm:$0xff]  }
  0x69   : > { %v1683_v25 = vld [vmem:[#allocation5 + $0x180] ss:$8 sps:$4 sm:$0xff]  }
 0x135   : > { %v321_v26 = vpop.f32.mrb[0].mxu0 }
 0x136   : > { %v392_v27 = vpop.f32.mrb[0].mxu1  ;;  %v323_v28 = vpop.f32.mrb[1].mxu0  ;;  %v397_v31 = vmax.f32 %v321_v26, 0.0  ;;  %v1688_v26 = vld [vmem:[#allocation5 + $0x94] ss:$8 sps:$4 sm:$0xff]  }
 0x137   : > { %v398_v29 = vmax.f32 %v323_v28, 0.0  ;;  %v394_v30 = vpop.f32.mrb[1].mxu1  ;;  %v399_v34 = vmax.f32 %v392_v27, 0.0  ;;  %v1691_v27 = vld [vmem:[#allocation5 + $0x194] ss:$8 sps:$4 sm:$0xff]  }
 0x138   : > { %v400_v32 = vmax.f32 %v394_v30, 0.0  ;;  %v1686_v28 = vld [vmem:[#allocation5 + $0x90] ss:$8 sps:$4 sm:$0xff]   ;;  %v1694_v30 = vld [vmem:[#allocation5 + $0xa4] ss:$8 sps:$4 sm:$0xff]  }
 0x139   : > { %1463 = vmatprep.subr.msk.mxu0 %vm418_vm1, %v398_v29  ;;  %v1689_v29 = vld [vmem:[#allocation5 + $0x190] ss:$8 sps:$4 sm:$0xff]  }
 0x13a   : > { %1469 = vmatprep.subr.msk.mxu1 %vm418_vm1, %v400_v32  ;;  %1464 = vmatpush1.msk.msra.mxu0 %vm418_vm1, %v397_v31  ;;  %v1697_v31 = vld [vmem:[#allocation5 + $0x1a4] ss:$8 sps:$4 sm:$0xff]   ;;  %v1692_v32 = vld [vmem:[#allocation5 + $0xa0] ss:$8 sps:$4 sm:$0xff]  }
 0x13b   : > { %1470 = vmatpush1.msk.msra.mxu1 %vm418_vm1, %v399_v34  ;;  %1465 = vmatmul.mubr.msk.f32.vlgmr.msra.gmra.mrb[2].mxu0 %vm405_vm2, %v401_v33  ;;  %v1700_v34 = vld [vmem:[#allocation5 + $0xb4] ss:$8 sps:$4 sm:$0xff]  }
 0x13c   : > { %1471 = vmatmul.mubr.msk.f32.vlgmr.msra.gmra.mrb[2].mxu1 %vm405_vm2, %v401_v33  ;;  %495 = vmatprep.mubr.f32.mxu0 %v1936_v0  ;;  %v1695_v33 = vld [vmem:[#allocation5 + $0x1a0] ss:$8 sps:$4 sm:$0xff]  }
 0x13d   : > { %590 = vmatprep.mubr.f32.mxu1 %v1936_v0  ;;  %1182 = vmatprep.subr.bf16.mxu1 %v1634_v35  ;;  %v1703_v35 = vld [vmem:[#allocation5 + $0x1b4] ss:$8 sps:$4 sm:$0xff]  }
 0x13e   : > { %1223 = vmatprep.subr.bf16.mxu0 %v1637_v37  ;;  %1183 = vmatpush1.bf16.msra.mxu1 %v1632_v36  ;;  %v1698_v36 = vld [vmem:[#allocation5 + $0xb0] ss:$8 sps:$4 sm:$0xff]  }
 0x13f   : > { %1466 = vmatmul.mubr.msk.f32.gmra.mrb[4].mxu0 %vm405_vm2, %v402_v38  ;;  %1184 = vmatprep.subr.bf16.mxu1 %v1640_v42  ;;  %v1701_v37 = vld [vmem:[#allocation5 + $0x1b0] ss:$8 sps:$4 sm:$0xff]   ;;  %v1712_v42 = vld [vmem:[#allocation5 + $0xd4] ss:$8 sps:$4 sm:$0xff]  }
 0x140   : > { %1472 = vmatmul.mubr.msk.f32.gmra.mrb[4].mxu1 %vm405_vm2, %v402_v38  ;;  %501 = vmatprep.mubr.f32.mxu0 %v1936_v0  ;;  %v1704_v38 = vld [vmem:[#allocation5 + $0xc0] ss:$8 sps:$4 sm:$0xff]  }
 0x141   : > { %596 = vmatprep.mubr.f32.mxu1 %v1936_v0  ;;  %1224 = vmatpush1.bf16.msra.mxu0 %v1635_v39  ;;  %v1706_v39 = vld [vmem:[#allocation5 + $0xc4] ss:$8 sps:$4 sm:$0xff]  }
 0x142   : > { %1225 = vmatprep.subr.bf16.mxu0 %v1643_v43  ;;  %1185 = vmatpush1.bf16.msra.mxu1 %v1638_v44  ;;  %v1715_v43 = vld [vmem:[#allocation5 + $0x1d4] ss:$8 sps:$4 sm:$0xff]   ;;  %v1710_v44 = vld [vmem:[#allocation5 + $0xd0] ss:$8 sps:$4 sm:$0xff]  }
 0x143   : > { %1467 = vmatmul.mubr.msk.f32.gmra.mrb[6].mxu0 %vm405_vm2, %v403_v40  ;;  %1186 = vmatprep.subr.bf16.mxu1 %v1646_v46  ;;  %v1718_v46 = vld [vmem:[#allocation5 + $0xe4] ss:$8 sps:$4 sm:$0xff]  }
 0x144   : > { %1473 = vmatmul.mubr.msk.f32.gmra.mrb[6].mxu1 %vm405_vm2, %v403_v40  ;;  %507 = vmatprep.mubr.f32.mxu0 %v1936_v0  ;;  %v1707_v40 = vld [vmem:[#allocation5 + $0x1c0] ss:$8 sps:$4 sm:$0xff]  }
 0x145   : > { %602 = vmatprep.mubr.f32.mxu1 %v1936_v0  ;;  %1226 = vmatpush1.bf16.msra.mxu0 %v1641_v45  ;;  %v1668_v0 = vld [vmem:[#allocation5 + $0x60] ss:$8 sps:$4 sm:$0xff]   ;;  %v1713_v45 = vld [vmem:[#allocation5 + $0x1d0] ss:$8 sps:$4 sm:$0xff]  }
 0x146   : > { %1227 = vmatprep.subr.bf16.mxu0 %v1649_v47  ;;  %1187 = vmatpush1.bf16.msra.mxu1 %v1644_v48  ;;  %v1721_v47 = vld [vmem:[#allocation5 + $0x1e4] ss:$8 sps:$4 sm:$0xff]   ;;  %v1716_v48 = vld [vmem:[#allocation5 + $0xe0] ss:$8 sps:$4 sm:$0xff]  }
 0x147   : > { %1468 = vmatmul.mubr.msk.f32.gmra.mrb[8].mxu0 %vm405_vm2, %v404_v41  ;;  %1188 = vmatprep.subr.bf16.mxu1 %v1652_v50  ;;  %v1724_v50 = vld [vmem:[#allocation5 + $0xf4] ss:$8 sps:$4 sm:$0xff]  }
 0x148   : > { %1474 = vmatmul.mubr.msk.f32.gmra.mrb[8].mxu1 %vm405_vm2, %v404_v41  ;;  %v1709_v41 = vld [vmem:[#allocation5 + $0x1c4] ss:$8 sps:$4 sm:$0xff]  }
 0x149   : > { %1228 = vmatpush1.bf16.msra.mxu0 %v1647_v49  ;;  %v1719_v49 = vld [vmem:[#allocation5 + $0x1e0] ss:$8 sps:$4 sm:$0xff]  }
 0x14a   : > { %1229 = vmatprep.subr.bf16.mxu0 %v1655_v51  ;;  %1189 = vmatpush1.bf16.msra.mxu1 %v1650_v52  ;;  %v1727_v51 = vld [vmem:[#allocation5 + $0x1f4] ss:$8 sps:$4 sm:$0xff]   ;;  %v1722_v52 = vld [vmem:[#allocation5 + $0xf0] ss:$8 sps:$4 sm:$0xff]  }
 0x14b   : > { %1190 = vmatprep.subr.bf16.mxu1 %v1658_v54 }
 0x14d   : > { %1230 = vmatpush1.bf16.msra.mxu0 %v1653_v53  ;;  %v1725_v53 = vld [vmem:[#allocation5 + $0x1f0] ss:$8 sps:$4 sm:$0xff]  }
 0x14e   : > { %1231 = vmatprep.subr.bf16.mxu0 %v1661_v55  ;;  %1191 = vmatpush1.bf16.msra.mxu1 %v1656_v56 }
 0x14f   : > { %1192 = vmatprep.subr.bf16.mxu1 %v1664_v58 }
 0x151   : > { %1232 = vmatpush1.bf16.msra.mxu0 %v1659_v57 }
 0x152   : > { %1233 = vmatprep.subr.bf16.mxu0 %v1667_v59  ;;  %1193 = vmatpush1.bf16.msra.mxu1 %v1662_v60 }
 0x153   : > { %1194 = vmatprep.subr.bf16.mxu1 %v1670_v62 }
 0x155   : > { %1234 = vmatpush1.bf16.msra.mxu0 %v1665_v61 }
 0x156   : > { %1235 = vmatprep.subr.bf16.mxu0 %v1673_v63  ;;  %1195 = vmatpush1.bf16.msra.mxu1 %v1668_v0 }
 0x157   : > { %1196 = vmatprep.subr.bf16.mxu1 %v1676_v8 }
 0x159   : > { %1236 = vmatpush1.bf16.msra.mxu0 %v1671_v4 }
 0x15a   : > { %1237 = vmatprep.subr.bf16.mxu0 %v1679_v9  ;;  %1197 = vmatpush1.bf16.msra.mxu1 %v1674_v13 }
 0x15b   : > { %1198 = vmatprep.subr.bf16.mxu1 %v1682_v18 }
 0x15d   : > { %1238 = vmatpush1.bf16.msra.mxu0 %v1677_v17 }
 0x15e   : > { %1239 = vmatprep.subr.bf16.mxu0 %v1685_v22  ;;  %1199 = vmatpush1.bf16.msra.mxu1 %v1680_v24 }
 0x15f   : > { %1200 = vmatprep.subr.bf16.mxu1 %v1688_v26 }
 0x161   : > { %1240 = vmatpush1.bf16.msra.mxu0 %v1683_v25 }
 0x162   : > { %1241 = vmatprep.subr.bf16.mxu0 %v1691_v27  ;;  %1201 = vmatpush1.bf16.msra.mxu1 %v1686_v28 }
 0x163   : > { %1202 = vmatprep.subr.bf16.mxu1 %v1694_v30 }
 0x165   : > { %1242 = vmatpush1.bf16.msra.mxu0 %v1689_v29 }
 0x166   : > { %1243 = vmatprep.subr.bf16.mxu0 %v1697_v31  ;;  %1203 = vmatpush1.bf16.msra.mxu1 %v1692_v32 }
 0x167   : > { %1204 = vmatprep.subr.bf16.mxu1 %v1700_v34 }
 0x169   : > { %1244 = vmatpush1.bf16.msra.mxu0 %v1695_v33 }
 0x16a   : > { %1245 = vmatprep.subr.bf16.mxu0 %v1703_v35  ;;  %1205 = vmatpush1.bf16.msra.mxu1 %v1698_v36 }
 0x16b   : > { %1206 = vmatprep.subr.bf16.mxu1 %v1706_v39 }
 0x16d   : > { %1246 = vmatpush1.bf16.msra.mxu0 %v1701_v37 }
 0x16e   : > { %1247 = vmatprep.subr.bf16.mxu0 %v1709_v41  ;;  %1207 = vmatpush1.bf16.msra.mxu1 %v1704_v38 }
 0x16f   : > { %1208 = vmatprep.subr.bf16.mxu1 %v1712_v42 }
 0x171   : > { %1248 = vmatpush1.bf16.msra.mxu0 %v1707_v40 }
 0x172   : > { %1249 = vmatprep.subr.bf16.mxu0 %v1715_v43  ;;  %1209 = vmatpush1.bf16.msra.mxu1 %v1710_v44 }
 0x173   : > { %1210 = vmatprep.subr.bf16.mxu1 %v1718_v46 }
 0x175   : > { %1250 = vmatpush1.bf16.msra.mxu0 %v1713_v45 }
 0x176   : > { %1251 = vmatprep.subr.bf16.mxu0 %v1721_v47  ;;  %1211 = vmatpush1.bf16.msra.mxu1 %v1716_v48 }
 0x177   : > { %1212 = vmatprep.subr.bf16.mxu1 %v1724_v50 }
 0x179   : > { %1252 = vmatpush1.bf16.msra.mxu0 %v1719_v49 }
 0x17a   : > { %1253 = vmatprep.subr.bf16.mxu0 %v1727_v51  ;;  %1213 = vmatpush1.bf16.msra.mxu1 %v1722_v52 }
 0x17d   : > { %1254 = vmatpush1.bf16.msra.mxu0 %v1725_v53 }
 0x20e   : > { %v491_v54 = vpop.f32.mrb[2].mxu0 }
 0x20f   : > { %v609_v55 = vsub.f32 0.0, %v491_v54  ;;  %v586_v56 = vpop.f32.mrb[2].mxu1  ;;  %v493_v57 = vpop.f32.mrb[3].mxu0 }
 0x210   : > { %v617_v58 = vsub.f32 0.0, %v586_v56  ;;  %v588_v59 = vpop.f32.mrb[3].mxu1  ;;  %v610_v60 = vsub.f32 0.0, %v493_v57 }
 0x211   : > { %v625_v61 = vmul.f32 1.442695, %v609_v55  ;;  %v618_v62 = vsub.f32 0.0, %v588_v59 }
 0x212   : > { %v497_v63 = vpop.f32.mrb[4].mxu0  ;;  %v641_v9 = vmul.f32 1.442695, %v617_v58  ;;  %v627_v17 = vmul.f32 1.442695, %v610_v60 }
 0x213   : > { %v611_v0 = vsub.f32 0.0, %v497_v63  ;;  %v592_v4 = vpop.f32.mrb[4].mxu1  ;;  %v499_v8 = vpop.f32.mrb[5].mxu0  ;;  %1728 = vpow2.f32 %v625_v61  ;;  %v643_v22 = vmul.f32 1.442695, %v618_v62 }
 0x214   : > { %v594_v13 = vpop.f32.mrb[5].mxu1  ;;  %v619_v24 = vsub.f32 0.0, %v592_v4  ;;  %v612_v29 = vsub.f32 0.0, %v499_v8 }
 0x215   : > { %v629_v18 = vmul.f32 1.442695, %v611_v0  ;;  %v620_v31 = vsub.f32 0.0, %v594_v13 }
 0x216   : > { %v503_v25 = vpop.f32.mrb[6].mxu0  ;;  %v645_v33 = vmul.f32 1.442695, %v619_v24  ;;  %v631_v40 = vmul.f32 1.442695, %v612_v29 }
 0x217   : > { %1730 = vpow2.f32 %v629_v18  ;;  %v613_v26 = vsub.f32 0.0, %v503_v25  ;;  %v598_v27 = vpop.f32.mrb[6].mxu1  ;;  %v505_v28 = vpop.f32.mrb[7].mxu0  ;;  %v647_v43 = vmul.f32 1.442695, %v620_v31 }
 0x218   : > { %1732 = vpow2.f32 %v641_v9  ;;  %v600_v30 = vpop.f32.mrb[7].mxu1  ;;  %v621_v34 = vsub.f32 0.0, %v598_v27  ;;  %v614_v36 = vsub.f32 0.0, %v505_v28 }
 0x219   : > { %1734 = vpow2.f32 %v627_v17  ;;  %v633_v32 = vmul.f32 1.442695, %v613_v26  ;;  %v622_v41 = vsub.f32 0.0, %v600_v30 }
 0x21a   : > { %1736 = vpow2.f32 %v643_v22  ;;  %v509_v35 = vpop.f32.mrb[8].mxu0  ;;  %v649_v45 = vmul.f32 1.442695, %v621_v34  ;;  %v635_v46 = vmul.f32 1.442695, %v614_v36 }
 0x21b   : > { %1738 = vpow2.f32 %v633_v32  ;;  %v615_v37 = vsub.f32 0.0, %v509_v35  ;;  %v604_v38 = vpop.f32.mrb[8].mxu1  ;;  %v511_v39 = vpop.f32.mrb[9].mxu0  ;;  %v651_v48 = vmul.f32 1.442695, %v622_v41 }
 0x21c   : > { %v606_v42 = vpop.f32.mrb[9].mxu1  ;;  %1740 = vpow2.f32 %v645_v33  ;;  %v623_v57 = vsub.f32 0.0, %v604_v38  ;;  %v616_v60 = vsub.f32 0.0, %v511_v39 }
 0x21d   : > { %v637_v44 = vmul.f32 1.442695, %v615_v37  ;;  %v1729_v47 = vpop.eup %1728  ;;  %v624_v62 = vsub.f32 0.0, %v606_v42 }
 0x21e   : > { %v657_v53 = vadd.f32 1.0, %v1729_v47  ;;  %v653_v4 = vmul.f32 1.442695, %v623_v57  ;;  %v639_v13 = vmul.f32 1.442695, %v616_v60 }
 0x21f   : > { %1742 = vpow2.f32 %v637_v44  ;;  %v655_v18 = vmul.f32 1.442695, %v624_v62 }
 0x220   : > { %1744 = vpow2.f32 %v631_v40 }
 0x221   : > { %v1731_v49 = vpop.eup %1730  ;;  %1746 = vpow2.f32 %v647_v43 }
 0x222   : > { %v1733_v50 = vpop.eup %1732  ;;  %v659_v51 = vadd.f32 1.0, %v1731_v49  ;;  %1748 = vpow2.f32 %v649_v45 }
 0x223   : > { %v1735_v52 = vpop.eup %1734  ;;  %1750 = vpow2.f32 %v635_v46  ;;  %v665_v56 = vadd.f32 1.0, %v1733_v50 }
 0x224   : > { %v1737_v54 = vpop.eup %1736  ;;  %1752 = vpow2.f32 %v651_v48  ;;  %v658_v58 = vadd.f32 1.0, %v1735_v52 }
 0x225   : > { %v1739_v55 = vpop.eup %1738  ;;  %1754 = vrcp.f32 %v659_v51  ;;  %v666_v61 = vadd.f32 1.0, %v1737_v54 }
 0x226   : > { %v661_v59 = vadd.f32 1.0, %v1739_v55  ;;  %1756 = vrcp.f32 %v657_v53  ;;  %v1741_v63 = vpop.eup %1740 }
 0x227   : > { %v667_v24 = vadd.f32 1.0, %v1741_v63 }
 0x228   : > { %1758 = vrcp.f32 %v661_v59 }
 0x229   : > { %v1743_v0 = vpop.eup %1742  ;;  %1760 = vrcp.f32 %v665_v56 }
 0x22a   : > { %v1745_v8 = vpop.eup %1744  ;;  %1762 = vrcp.f32 %v658_v58  ;;  %v663_v9 = vadd.f32 1.0, %v1743_v0 }
 0x22b   : > { %v1747_v17 = vpop.eup %1746  ;;  %1764 = vrcp.f32 %v666_v61  ;;  %v660_v26 = vadd.f32 1.0, %v1745_v8 }
 0x22c   : > { %v1749_v22 = vpop.eup %1748  ;;  %1766 = vrcp.f32 %v663_v9  ;;  %v668_v28 = vadd.f32 1.0, %v1747_v17 }
 0x22d   : > { %v1751_v25 = vpop.eup %1750  ;;  %1768 = vpow2.f32 %v653_v4  ;;  %v669_v30 = vadd.f32 1.0, %v1749_v22 }
 0x22e   : > { %v1753_v27 = vpop.eup %1752  ;;  %1770 = vpow2.f32 %v639_v13  ;;  %v662_v31 = vadd.f32 1.0, %v1751_v25 }
 0x22f   : > { %v1755_v29 = vpop.eup %1754  ;;  %1772 = vpow2.f32 %v655_v18  ;;  %v670_v33 = vadd.f32 1.0, %v1753_v27 }
 0x230   : > { %1774 = vrcp.f32 %v667_v24  ;;  %v1757_v32 = vpop.eup %1756  ;;  %v2219_v35 = vmul.f32 %v1755_v29, %v2141_v7 }
 0x231   : > { %1776 = vrcp.f32 %v660_v26  ;;  %v2222_v38 = vmul.f32 %v1757_v32, %v2138_v6 }
 0x232   : > { %v1759_v34 = vpop.eup %1758  ;;  %1778 = vrcp.f32 %v668_v28 }
 0x233   : > { %v1761_v36 = vpop.eup %1760  ;;  %1780 = vrcp.f32 %v669_v30  ;;  %v2225_v39 = vmul.f32 %v1759_v34, %v2172_v19  ;;  %v705_v42 = vadd.f32 %v2219_v35, %v2222_v38  ;;  %v741_v7 = vmax.f32 %v2222_v38, %v2219_v35 }
 0x234   : > { %v1763_v37 = vpop.eup %1762  ;;  %1782 = vrcp.f32 %v662_v31  ;;  %v2245_v61 = vmul.f32 %v1761_v36, %v2148_v10 }
 0x235   : > { %v1765_v40 = vpop.eup %1764  ;;  %1784 = vrcp.f32 %v670_v33  ;;  %v706_v6 = vadd.f32 %v705_v42, %v2225_v39  ;;  %v742_v19 = vmax.f32 %v741_v7, %v2225_v39  ;;  %v2254_v0 = vmul.f32 %v1763_v37, %v2124_v1 }
 0x236   : > { %v1767_v41 = vpop.eup %1766 }
 0x237   : > { %v1769_v43 = vpop.eup %1768  ;;  %v2232_v44 = vmul.f32 %v1767_v41, %v2175_v20 }
 0x238   : > { %v1771_v45 = vpop.eup %1770  ;;  %v671_v46 = vadd.f32 1.0, %v1769_v43 }
 0x239   : > { %v1773_v47 = vpop.eup %1772  ;;  %v664_v48 = vadd.f32 1.0, %v1771_v45  ;;  %v707_v50 = vadd.f32 %v706_v6, %v2232_v44  ;;  %v743_v51 = vmax.f32 %v742_v19, %v2232_v44 }
 0x23a   : > { %v1775_v49 = vpop.eup %1774  ;;  %1786 = vrcp.f32 %v671_v46  ;;  %v672_v52 = vadd.f32 1.0, %v1773_v47 }
 0x23b   : > { %v1777_v53 = vpop.eup %1776  ;;  %1788 = vrcp.f32 %v664_v48  ;;  %v2239_v56 = vmul.f32 %v1775_v49, %v2151_v11  ;;  %v708_v57 = vrot.slane %v707_v50, 4  ;;  %v744_v58 = vrot.slane %v743_v51, 4 }
 0x23c   : > { %v1779_v54 = vpop.eup %1778  ;;  %1790 = vrcp.f32 %v672_v52  ;;  %v2242_v60 = vmul.f32 %v1777_v53, %v2127_v2  ;;  %v2257_v11 = vmul.f32 %v1765_v40, %v2130_v3 }
 0x23d   : > { %v1781_v20 = vpop.eup %1780  ;;  %v2248_v62 = vmul.f32 %v1779_v54, %v2135_v5  ;;  %v723_v2 = vadd.f32 %v2239_v56, %v2245_v61  ;;  %v709_v5 = vadd.f32 %v708_v57, %v707_v50  ;;  %v745_v8 = vmax.f32 %v743_v51, %v744_v58 }
 0x23e   : > { %v1783_v55 = vpop.eup %1782  ;;  %v2251_v63 = vmul.f32 %v1781_v20, %v2178_v21  ;;  %v759_v21 = vmax.f32 %v2245_v61, %v2239_v56  ;;  %v714_v1 = vadd.f32 %v2242_v60, %v2254_v0  ;;  %v750_v3 = vmax.f32 %v2254_v0, %v2242_v60 }
 0x23f   : > { %v1785_v59 = vpop.eup %1784  ;;  %v2260_v4 = vmul.f32 %v1783_v55, %v2154_v12  ;;  %v732_v13 = vadd.f32 %v2248_v62, %v2257_v11  ;;  %v710_v29 = vrot.slane %v709_v5, 2  ;;  %v746_v30 = vrot.slane %v745_v8, 2 }
 0x240   : > { %v2265_v10 = vmul.f32 %v1785_v59, %v2162_v15  ;;  %v724_v12 = vadd.f32 %v723_v2, %v2251_v63  ;;  %v768_v15 = vmax.f32 %v2257_v11, %v2248_v62  ;;  %v760_v18 = vmax.f32 %v759_v21, %v2251_v63 }
 0x241   : > { %v715_v24 = vadd.f32 %v714_v1, %v2260_v4  ;;  %v751_v25 = vmax.f32 %v750_v3, %v2260_v4  ;;  %v711_v43 = vadd.f32 %v710_v29, %v709_v5  ;;  %v747_v45 = vmax.f32 %v745_v8, %v746_v30 }
 0x242   : > { %v733_v28 = vadd.f32 %v732_v13, %v2265_v10 }
 0x243   : > { %v712_v20 = vrot.slane %v711_v43, 1  ;;  %v748_v55 = vrot.slane %v747_v45, 1 }
 0x244   : > { %v1787_v9 = vpop.eup %1786 }
 0x245   : > { %v1789_v17 = vpop.eup %1788  ;;  %v2280_v22 = vmul.f32 %v1787_v9, %v2183_v23  ;;  %v769_v23 = vmax.f32 %v768_v15, %v2265_v10  ;;  %v713_v15 = vadd.f32 %v712_v20, %v711_v43 }
 0x246   : > { %v1791_v26 = vpop.eup %1790  ;;  %v2285_v27 = vmul.f32 %v1789_v17, %v2159_v14  ;;  %v749_v17 = vmax.f32 %v747_v45, %v748_v55 }
 0x247   : > { %v725_v31 = vadd.f32 %v724_v12, %v2280_v22  ;;  %v761_v32 = vmax.f32 %v760_v18, %v2280_v22  ;;  %v2291_v33 = vmul.f32 %v1791_v26, %v2165_v16 }
 0x248   : > { %v716_v34 = vadd.f32 %v715_v24, %v2285_v27  ;;  %v752_v36 = vmax.f32 %v751_v25, %v2285_v27 }
 0x249   : > { %v726_v37 = vrot.slane %v725_v31, 4  ;;  %v762_v14 = vrot.slane %v761_v32, 4  ;;  %v734_v40 = vadd.f32 %v733_v28, %v2291_v33  ;;  %v770_v41 = vmax.f32 %v769_v23, %v2291_v33 }
 0x24a   : > { %v717_v42 = vrot.slane %v716_v34, 4  ;;  %v753_v7 = vrot.slane %v752_v36, 4 }
 0x24b   : > { %v735_v6 = vrot.slane %v734_v40, 4  ;;  %v771_v19 = vrot.slane %v770_v41, 4  ;;  %v727_v16 = vadd.f32 %v726_v37, %v725_v31  ;;  %v763_v46 = vmax.f32 %v761_v32, %v762_v14 }
 0x24c   : > { %v718_v47 = vadd.f32 %v717_v42, %v716_v34  ;;  %v754_v48 = vmax.f32 %v752_v36, %v753_v7 }
 0x24d   : > { %v736_v49 = vadd.f32 %v735_v6, %v734_v40  ;;  %v772_v50 = vmax.f32 %v770_v41, %v771_v19  ;;  %v728_v51 = vrot.slane %v727_v16, 2  ;;  %v764_v52 = vrot.slane %v763_v46, 2 }
 0x24e   : > { %v719_v53 = vrot.slane %v718_v47, 2  ;;  %v755_v54 = vrot.slane %v754_v48, 2 }
 0x24f   : > { %v737_v57 = vrot.slane %v736_v49, 2  ;;  %v773_v58 = vrot.slane %v772_v50, 2  ;;  %v729_v59 = vadd.f32 %v728_v51, %v727_v16  ;;  %v765_v2 = vmax.f32 %v763_v46, %v764_v52 }
 0x250   : > { %v720_v5 = vadd.f32 %v719_v53, %v718_v47  ;;  %v756_v8 = vmax.f32 %v754_v48, %v755_v54 }
 0x251   : > { %v738_v21 = vadd.f32 %v737_v57, %v736_v49  ;;  %v774_v1 = vmax.f32 %v772_v50, %v773_v58  ;;  %v730_v3 = vrot.slane %v729_v59, 1  ;;  %v766_v9 = vrot.slane %v765_v2, 1 }
 0x252   : > { %v721_v12 = vrot.slane %v720_v5, 1  ;;  %v757_v13 = vrot.slane %v756_v8, 1  ;;  %v1937_v57 = vmov 1966171168  }
 0x253   : > { %v739_v18 = vrot.slane %v738_v21, 1  ;;  %v775_v24 = vrot.slane %v774_v1, 1  ;;  %v731_v25 = vadd.f32 %v730_v3, %v729_v59  ;;  %v767_v26 = vmax.f32 %v765_v2, %v766_v9 }
 0x254   : > { %v722_v28 = vadd.f32 %v721_v12, %v720_v5  ;;  %v758_v29 = vmax.f32 %v756_v8, %v757_v13  ;;  %v1278_v58 = vunpack.c.l.s4 %v1937_v57  ;;  %v1280_v59 = vlaneseq }
 0x255   : > { %v740_v30 = vadd.f32 %v739_v18, %v738_v21  ;;  %v776_v31 = vmax.f32 %v774_v1, %v775_v24  ;;  %v782_v32 = vsel %vm781_vm3, %v731_v25, %v713_v15  ;;  %v790_v23 = vsel %vm781_vm3, %v767_v26, %v749_v17 }
 0x256   : > { %v794_v40 = vpack.c.bf16 %v782_v32, %v782_v32  ;;  %v796_v41 = vpack.c.bf16 %v790_v23, %v790_v23  ;;  %v1279_v2 = vunpack.c.0.s8 %v1278_v58  ;;  %v1281_v5 = vshrl.u32 %v1280_v59, 7 }
 0x257   : > { %v783_v34 = vsel %vm781_vm3, %v740_v30, %v722_v28  ;;  %v791_v36 = vsel %vm781_vm3, %v776_v31, %v758_v29 }
 0x258   : > { %v795_v37 = vpack.c.bf16 %v783_v34, %v783_v34  ;;  %v797_v14 = vpack.c.bf16 %v791_v36, %v791_v36  ;;  %v1282_v21 = vsub.s32 %v1279_v2, %v1281_v5  ;;  %v1301_v12 = vsub.s32 0, %v1281_v5 }
 0x259   : > { %v1305_v13 = vsub.s32 1, %v1281_v5 }
 0x25a   : > { %1214 = vmatprep.mubr.bf16.mxu1 %v795_v37  ;;  %1255 = vmatprep.mubr.bf16.mxu0 %v797_v14 }
 0x25b   : > { %1215 = vmatmul.mubr.bf16.vlgmr.msra.gmra.mrb[12].mxu1 %v794_v40  ;;  %1256 = vmatmul.mubr.bf16.vlgmr.msra.gmra.mrb[12].mxu0 %v796_v41 }
 0x32e   : > { %v1216_v42 = vpop.f32.mrb[12].mxu1  ;;  %v1257_v7 = vpop.f32.mrb[12].mxu0 }
 0x32f   : > { %v1258_v43 = vadd.f32 %v1257_v7, %v1216_v42  ;;  %v1218_v45 = vpop.f32.mrb[13].mxu1  ;;  %v1259_v6 = vpop.f32.mrb[13].mxu0 }
 0x330   : > { %v1260_v19 = vadd.f32 %v1259_v6, %v1218_v45  ;;  %v1220_v16 = vpop.f32.mrb[14].mxu1  ;;  %v1261_v46 = vpop.f32.mrb[14].mxu0 }
 0x331   : > { %v1264_v47 = vsub.f32 0.0, %v1258_v43  ;;  %v1221_v48 = vpop.f32.mrb[15].mxu1  ;;  %v1262_v49 = vpop.f32.mrb[15].mxu0 }
 0x332   : > { %v1265_v50 = vsub.f32 0.0, %v1260_v19 }
 0x333   : > { %v1266_v51 = vmul.f32 1.442695, %v1264_v47 }
 0x334   : > { %v1268_v52 = vmul.f32 1.442695, %v1265_v50 }
 0x335   : > { %1792 = vpow2.f32 %v1266_v51 }
 0x336   : > { %1794 = vpow2.f32 %v1268_v52 }
 0x33f   : > { %v1793_v53 = vpop.eup %1792 }
 0x340   : > { %v1795_v54 = vpop.eup %1794  ;;  %v1270_v20 = vadd.f32 1.0, %v1793_v53 }
 0x341   : > { %v1271_v55 = vadd.f32 1.0, %v1795_v54 }
 0x342   : > { %1796 = vrcp.f32 %v1270_v20 }
 0x343   : > { %1798 = vrcp.f32 %v1271_v55 }
 0x34c   : > { %v1797_v8 = vpop.eup %1796 }
 0x34d   : > { %v1799_v1 = vpop.eup %1798 }
 0x34e   : > { %v1276_v3 = vcombine.low %v1797_v8, %v1799_v1 }
 0x350   : > { %v1283_v9 = vrot.slane %v1276_v3, %v1282_v21 }
 0x352   : > { %v1284_v15 = vcombine.high %v1283_v9, %v1283_v9  ;;  %v1291_v17 = vrot.slane %v1283_v9, %v1282_v21 }
 0x354   : > { %v1298_v18 = vrot.slane %v1284_v15, %v1282_v21  ;;  %v1302_v24 = vrot.slane %v1291_v17, %v1301_v12  ;;  %v1306_v25 = vrot.slane %v1291_v17, %v1305_v13 }
 0x356   : > { %v1310_v26 = vrot.slane %v1298_v18, %v1301_v12  ;;  %v1314_v28 = vrot.slane %v1298_v18, %v1305_v13  ;;  %v1319_v29 = vmul.f32 %v1302_v24, %v2222_v38  ;;  %v1320_v30 = vmul.f32 %v1306_v25, %v2254_v0 }
 0x357   : > { %v1321_v31 = vmul.f32 %v1302_v24, %v2219_v35  ;;  %v1322_v32 = vmul.f32 %v1306_v25, %v2242_v60  ;;  %v1323_v38 = vmul.f32 %v1302_v24, %v2225_v39  ;;  %v1324_v0 = vmul.f32 %v1306_v25, %v2260_v4 }
 0x358   : > { %v1325_v23 = vmul.f32 %v1302_v24, %v2232_v44  ;;  %v1326_v34 = vmul.f32 %v1306_v25, %v2285_v27  ;;  %v1327_v36 = vmul.f32 %v1310_v26, %v2245_v61  ;;  %v1328_v37 = vmul.f32 %v1314_v28, %v2257_v11  ;;  %1335 = vst [vmem:[%s2307_s25] sm:$0xff] %v1319_v29 }
 0x359   : > { %1336 = vst [vmem:[%s2307_s25 + $0x8] sm:$0xff] %v1320_v30  ;;  %v1329_v35 = vmul.f32 %v1310_v26, %v2239_v56  ;;  %v1330_v39 = vmul.f32 %v1314_v28, %v2248_v62  ;;  %v1331_v44 = vmul.f32 %v1310_v26, %v2251_v63  ;;  %v1332_v60 = vmul.f32 %v1314_v28, %v2265_v10 }
 0x35a   : > { %1337 = vst [vmem:[%s2307_s25 + $0x10] sm:$0xff] %v1321_v31  ;;  %1338 = vst [vmem:[%s2307_s25 + $0x18] sm:$0xff] %v1322_v32  ;;  %v1333_v56 = vmul.f32 %v1310_v26, %v2280_v22  ;;  %v1334_v61 = vmul.f32 %v1314_v28, %v2291_v33 }
 0x35b   : > { %1339 = vst [vmem:[%s2307_s25 + $0x20] sm:$0xff] %v1323_v38  ;;  %1340 = vst [vmem:[%s2307_s25 + $0x28] sm:$0xff] %v1324_v0 }
 0x35c   : > { %1341 = vst [vmem:[%s2307_s25 + $0x30] sm:$0xff] %v1325_v23  ;;  %1342 = vst [vmem:[%s2307_s25 + $0x38] sm:$0xff] %v1326_v34 }
 0x35d   : > { %1343 = vst [vmem:[%s2307_s25 + $0x40] sm:$0xff] %v1327_v36  ;;  %1344 = vst [vmem:[%s2307_s25 + $0x48] sm:$0xff] %v1328_v37 }
 0x35e   : > { %1345 = vst [vmem:[%s2307_s25 + $0x50] sm:$0xff] %v1329_v35  ;;  %1346 = vst [vmem:[%s2307_s25 + $0x58] sm:$0xff] %v1330_v39 }
 0x35f   : > { %1347 = vst [vmem:[%s2307_s25 + $0x60] sm:$0xff] %v1331_v44  ;;  %1348 = vst [vmem:[%s2307_s25 + $0x68] sm:$0xff] %v1332_v60 }
 0x360   : > { %1349 = vst [vmem:[%s2307_s25 + $0x70] sm:$0xff] %v1333_v56  ;;  %1350 = vst [vmem:[%s2307_s25 + $0x78] sm:$0xff] %v1334_v61 }
 0x361   : > { %1871 = shalt.err (!%p1868_p7)
}
 0x362   : > { %s1872_s29 = scalar_lea.hbm %s2331_s14, 2048  ;;  %s1876_s5 = scalar_lea.hbm %s2393_s4, 4096 }
 0x363   : > { %p1873_p9 = scmp.ne.s32.totalorder %s2331_s14, %s1872_s29  ;;  %p1877_p5 = scmp.lt.u32.totalorder %s2331_s14, %s2393_s4 }
 0x364   : > { %p1878_p11 = scmp.lt.u32.totalorder %s1876_s5, %s1872_s29  ;;  %p1880_p4 = scmp.lt.u32.totalorder %s1872_s29, %s2331_s14 }
 0x365   : > { %p1874_p2 = pnand %p1873_p9, %p2057_p12 }
 0x366   : > { %p1879_p1 = por %p1878_p11, %p1877_p5 }
 0x367   : > { %p1875_p0 = pneg %p1874_p2 }
 0x368   : > { %p1881_p6 = por %p1880_p4, %p1879_p1 }
 0x36a   : > { %p1882_p8 = pnand %p1881_p6, %p1875_p0 }
 0x36c   : > { %1885 = shalt.err (!%p1882_p8)
}
 0x36d   : > { %s1939_s8 = smov 256   ;;  %s1940_s25 = smov 16  }
 0x36e   : > { %1573 = dma.vmem_to_hbm [thread:$0]  (%p2057_p12), %s2333_s11, 2048, %s2331_s14, %s1352_s20, %s1939_s8, %s1939_s8, %s1940_s25  }
 0x36f PF: > { %s1381_s19 = sand.u32 1, %s1916_s15   ;;  %p2408_p10 = scmp.ne.s32.totalorder %s2398_s22, 0 }
 0x370   : > { %p2409_p13 = scmp.ge.s32.totalorder %s1928_s18, 2  ;;  %s1382_s13 = scalar_lea.sflag [#allocation4], %s1381_s19 }
 0x372   : > { %p1584_p3 = pnand %p2409_p13, %p2408_p10 }
 0x374   : > { %1911 = dma.done.wait (!%p1584_p3), %s1382_s13, 2048  }
 0x375   : > { %1913 = vsyncadd (!%p1584_p3), %s1382_s13, 4294965248  ;;  %p18_p7 = scmp.ge.s32.totalorder %s2022_s27, 4   ;;  %s2410_s15 = smov %s1920_s16 }
 0x376   : > { %s2411_s16 = smov %s1924_s17  ;;  %s2412_s17 = smov %s2053_s24 }
 0x377   : > { %s2413_s18 = smov %s2022_s27  ;;  %20 = sbr.rel (!%p18_p7) target bundleno = 6 (0x6), region = 85 }
 0x37e   :  { %1387 = vsyncpa [#allocation3], 1 }
 0x37f   :  { %1389 = vsyncpa [#allocation3 + $0x1], 1 }
 0x380   :  { %1390 = vsyncpa [#allocation6], 1 }
 0x381   :  { %1391 = vsyncpa [#allocation4], 1 }
 0x382   :  { %1393 = vsyncpa [#allocation4 + $0x1], 1 }

</bundles_post_ra>
